<compile_context>
chip_gen: v7x
topology: tpu7x:2x2x1
jax: 0.10.0
libtpu: 0.0.40
codegen_flags: <defaults>
</compile_context>

<pallas_src>
import functools

import jax
import jax.numpy as jnp
from jax.experimental import pallas as pl
from jax.experimental.pallas import tpu as pltpu


def _round_up(x, m):
    return ((x + m - 1) // m) * m


def attention_kernel(h_ref, att_feats_ref, p_att_ref,
                     w_h_ref, b_h_ref, w_a_ref, out_ref,
                     *, att_size, s_chunk):
    tb, s_pad, rnn_pad = att_feats_ref.shape

    # ---- h2att linear: (TB, rnn) @ (rnn, att_hid) + bias   (MXU, f32 acc) ---
    att_h = jnp.dot(h_ref[...], w_h_ref[...],
                    preferred_element_type=jnp.float32) + b_h_ref[...]

    # ---- tanh(p_att + att_h[:, None, :]) -> (TB, S, att_hid) ----------------
    # Slabs stream as bf16; compute in f32.
    # TODO(synk): on v6e/v7x the tanh/mul could run in bf16 (bf16 EUP/VPU) for
    # extra slot headroom; v5e has no bf16 VPU/EUP so f32 is kept everywhere.
    dot = jnp.tanh(p_att_ref[...].astype(jnp.float32) + att_h[:, None, :])

    # ---- alpha_net (N=1 projection): VPU mul + lane reduce, f32 accum -------
    # alpha_net bias dropped: softmax is shift-invariant, so it cancels.
    scores = jnp.sum(dot * w_a_ref[...][None, :, :], axis=-1)        # (TB, S)

    # ---- mask padded attention positions (static padding) -------------------
    if att_size < s_pad:
        lane_idx = jax.lax.broadcasted_iota(jnp.int32, scores.shape, 1)
        scores = jnp.where(lane_idx < att_size, scores, -1e30)

    # ---- softmax over att_size ----------------------------------------------
    m = jnp.max(scores, axis=-1, keepdims=True)
    e = jnp.exp(scores - m)
    inv_denom = pl.reciprocal(jnp.sum(e, axis=-1, keepdims=True), approx=True)
    weight = e * inv_denom                                            # (TB, S)

    # ---- weighted sum over att_feats, chunked over S ------------------------
    # Only a (TB, s_chunk, rnn) f32 temporary is live per step instead of the
    # full (TB, S, rnn) product; static slices are free views on the ref.
    acc = jnp.zeros((tb, rnn_pad), jnp.float32)
    for c in range(s_pad // s_chunk):
        lo = c * s_chunk
        f_c = att_feats_ref[:, lo:lo + s_chunk, :].astype(jnp.float32)
        w_c = weight[:, lo:lo + s_chunk]
        acc = acc + jnp.sum(w_c[:, :, None] * f_c, axis=1)
    out_ref[...] = acc.astype(out_ref.dtype)


def prepare_params(params, rnn_size, att_hid_size):
    """One-time parameter preprocessing: transpose + zero-pad lane dims to
    multiples of 128 so all kernel loads/stores are lane-dense."""
    rnn_pad = _round_up(rnn_size, 128)
    hid_pad = _round_up(att_hid_size, 128)
    w_h = jnp.asarray(params["h2att_w"], jnp.float32).T              # (rnn, hid)
    b_h = jnp.asarray(params["h2att_b"], jnp.float32).reshape(1, att_hid_size)
    w_a = jnp.asarray(params["alpha_w"], jnp.float32).reshape(1, att_hid_size)
    w_h = jnp.pad(w_h, ((0, rnn_pad - rnn_size), (0, hid_pad - att_hid_size)))
    b_h = jnp.pad(b_h, ((0, 0), (0, hid_pad - att_hid_size)))
    w_a = jnp.pad(w_a, ((0, 0), (0, hid_pad - att_hid_size)))
    # alpha_net bias intentionally dropped (softmax shift-invariance).
    return {"w_h": w_h, "b_h": b_h, "w_a": w_a}


def _vmem_limit_bytes():
    """Scoped-VMEM limit: ~3/4 of physical VMEM, capped at 96 MiB.
    (128 MiB v5e/v6e -> 96 MiB; 64 MiB v7x -> 48 MiB.)"""
    try:
        cap = int(pltpu.get_tpu_info().vmem_capacity_bytes)
    except Exception:
        cap = 64 * 1024 * 1024
    return int(min(cap * 3 // 4, 96 * 1024 * 1024))


def _pick_block_b(B, s_pad, rnn_pad, hid_pad, vmem_limit,
                  slab_bytes=2, s_chunk=16):
    """Largest batch tile whose double-buffered slabs PLUS the in-kernel f32
    temporaries fit roughly half the scoped VMEM limit, capped so the batch
    grid keeps >=2 steps on larger batches (megacore / pipeline overlap)."""
    # Double-buffered streamed input slabs (bf16 by default).
    per_row = 2 * slab_bytes * s_pad * (rnn_pad + hid_pad)
    # f32 elementwise temporaries: upcast/add, tanh output, dot*w_a product.
    per_row += 3 * 4 * s_pad * hid_pad
    # Chunked weighted-sum temporary + accumulator + h/out blocks (f32).
    per_row += 4 * s_chunk * rnn_pad + 6 * 4 * rnn_pad
    tb = max(1, (vmem_limit // 2) // max(per_row, 1))
    tb = int(min(tb, B, 256))
    # Keep >=2 grid steps (ideally 4+) when the batch is big enough: v7x has
    # two TensorCores and the pipeline needs multiple steps to hide DMA.
    if B >= 16:
        tb = min(tb, max(8, ((B // 4) // 8) * 8))
    if tb < B:
        # Blocked (non-full) sublane dims must be multiples of 8.
        tb = min(max(8, (tb // 8) * 8), B)
    else:
        tb = B
    return tb


def attention_forward(h, att_feats, p_att_feats, prepped, rnn_size, att_hid_size,
                      block_b=None, slab_dtype=jnp.bfloat16):
    """Forward pass matching torch Attention.forward (one decode step)."""
    B = att_feats.shape[0]
    att_size = att_feats.size // B // rnn_size
    rnn_pad, hid_pad = prepped["w_h"].shape

    att_feats_ = att_feats.reshape(B, att_size, rnn_size)
    p_att_ = p_att_feats.reshape(B, att_size, att_hid_size)

    # Pad S to a multiple of 16 (bf16 sublane tile) and lane dims to 128;
    # the kernel masks padded S positions inside the softmax.
    s_pad = _round_up(att_size, 16)
    att_feats_ = jnp.pad(
        jnp.asarray(att_feats_, jnp.float32),
        ((0, 0), (0, s_pad - att_size), (0, rnn_pad - rnn_size))).astype(slab_dtype)
    p_att_ = jnp.pad(
        jnp.asarray(p_att_, jnp.float32),
        ((0, 0), (0, s_pad - att_size), (0, hid_pad - att_hid_size))).astype(slab_dtype)
    h_ = jnp.pad(jnp.asarray(h, jnp.float32), ((0, 0), (0, rnn_pad - rnn_size)))

    vmem_limit = _vmem_limit_bytes()
    tb = block_b if block_b is not None else _pick_block_b(
        B, s_pad, rnn_pad, hid_pad, vmem_limit,
        slab_bytes=jnp.dtype(slab_dtype).itemsize)

    # Pad the batch to a multiple of tb so the tail tile never reads garbage
    # rows (zero rows stay finite through the masked softmax).
    b_pad = _round_up(B, tb)
    if b_pad != B:
        h_ = jnp.pad(h_, ((0, b_pad - B), (0, 0)))
        att_feats_ = jnp.pad(att_feats_, ((0, b_pad - B), (0, 0), (0, 0)))
        p_att_ = jnp.pad(p_att_, ((0, b_pad - B), (0, 0), (0, 0)))

    grid = (b_pad // tb,)
    s_chunk = 16  # divides s_pad by construction
    kernel = functools.partial(attention_kernel, att_size=att_size, s_chunk=s_chunk)

    out = pl.pallas_call(
        kernel,
        out_shape=jax.ShapeDtypeStruct((b_pad, rnn_pad), jnp.float32),
        grid=grid,
        in_specs=[
            pl.BlockSpec((tb, rnn_pad), lambda i: (i, 0)),
            pl.BlockSpec((tb, s_pad, rnn_pad), lambda i: (i, 0, 0)),
            pl.BlockSpec((tb, s_pad, hid_pad), lambda i: (i, 0, 0)),
            # Weights / biases stay VMEM-resident across grid steps.
            pl.BlockSpec((rnn_pad, hid_pad), lambda i: (0, 0)),
            pl.BlockSpec((1, hid_pad), lambda i: (0, 0)),
            pl.BlockSpec((1, hid_pad), lambda i: (0, 0)),
        ],
        out_specs=pl.BlockSpec((tb, rnn_pad), lambda i: (i, 0)),
        compiler_params=pltpu.CompilerParams(
            dimension_semantics=("parallel",),
            vmem_limit_bytes=vmem_limit,
        ),
    )(h_, att_feats_, p_att_, prepped["w_h"], prepped["b_h"], prepped["w_a"])

    return out[:B, :rnn_size]


def reference_forward(h, att_feats, p_att_feats, params, rnn_size, att_hid_size):
    """Pure-JAX f32 reference matching the PyTorch module."""
    B = att_feats.shape[0]
    att_size = att_feats.size // B // rnn_size
    att = p_att_feats.reshape(B, att_size, att_hid_size)
    att_h = h @ params["h2att_w"].T + params["h2att_b"]
    dot = jnp.tanh(att + att_h[:, None, :])
    scores = (dot.reshape(-1, att_hid_size) @ params["alpha_w"].T
              + params["alpha_b"]).reshape(B, att_size)
    weight = jax.nn.softmax(scores, axis=-1)
    att_feats_ = att_feats.reshape(B, att_size, rnn_size)
    return jnp.einsum('bs,bsr->br', weight, att_feats_)


if __name__ == "__main__":
    rnn_size = 32
    att_hid_size = 32
    B = 2
    att_size = 16

    key = jax.random.PRNGKey(0)
    k1, k2, k3, k4, k5, k6, k7 = jax.random.split(key, 7)

    # Deterministic synthetic parameters (shapes match nn.Linear in __init__).
    params = {
        "h2att_w": jax.random.normal(k1, (att_hid_size, rnn_size), jnp.float32) * 0.1,
        "h2att_b": jax.random.normal(k2, (att_hid_size,), jnp.float32) * 0.1,
        "alpha_w": jax.random.normal(k3, (1, att_hid_size), jnp.float32) * 0.1,
        "alpha_b": jax.random.normal(k4, (1,), jnp.float32) * 0.1,
    }
    prepped = prepare_params(params, rnn_size, att_hid_size)

    h = jax.random.normal(k5, (B, rnn_size), jnp.float32)
    att_feats = jax.random.normal(k6, (B, att_size, rnn_size), jnp.float32)
    p_att_feats = jax.random.normal(k7, (B, att_size, att_hid_size), jnp.float32)

    out = attention_forward(h, att_feats, p_att_feats, prepped,
                            rnn_size, att_hid_size)
    out = jax.block_until_ready(out)
    assert out.shape == (B, rnn_size)

    # Strict check: reference computed on identically bf16-quantized slabs
    # (the quantization is the intentional HBM-traffic optimization; the
    # remaining diff is the approx reciprocal + accumulation order).
    att_feats_q = att_feats.astype(jnp.bfloat16).astype(jnp.float32)
    p_att_q = p_att_feats.astype(jnp.bfloat16).astype(jnp.float32)
    ref_q = reference_forward(h, att_feats_q, p_att_q, params,
                              rnn_size, att_hid_size)
    assert jnp.allclose(out, ref_q, atol=2e-3, rtol=2e-3), (
        f"max abs diff vs quantized ref = {float(jnp.max(jnp.abs(out - ref_q)))}")

    # Loose sanity check against the full-f32 reference (bounds bf16 error).
    ref = reference_forward(h, att_feats, p_att_feats, params,
                            rnn_size, att_hid_size)
    assert jnp.allclose(out, ref, atol=5e-2, rtol=5e-2), (
        f"max abs diff vs f32 ref = {float(jnp.max(jnp.abs(out - ref)))}")

    print("KERNEL_OK")
</pallas_src>

<mosaic_0001>
module attributes {stable_mosaic.version = 11 : i64} {
  func.func @attention_kernel(%arg0: i32, %arg1: memref<2x128xf32, #tpu.memory_space<vmem>>, %arg2: memref<2x16x128xbf16, #tpu.memory_space<vmem>>, %arg3: memref<2x16x128xbf16, #tpu.memory_space<vmem>>, %arg4: memref<128x128xf32, #tpu.memory_space<vmem>>, %arg5: memref<1x128xf32, #tpu.memory_space<vmem>>, %arg6: memref<1x128xf32, #tpu.memory_space<vmem>>, %arg7: memref<2x128xf32, #tpu.memory_space<vmem>>) attributes {dimension_semantics = [#tpu.dimension_semantics<parallel>], iteration_bounds = array<i64: 1>, scalar_prefetch = 0 : i64, scratch_operands = 0 : i64, tpu.core_type = #tpu.core_type<tc>, window_params = [{transform_indices = @transform_0, window_bounds = array<i64: 2, 128>}, {transform_indices = @transform_1, window_bounds = array<i64: 2, 16, 128>}, {transform_indices = @transform_2, window_bounds = array<i64: 2, 16, 128>}, {pipeline_mode = #tpu.pipeline_mode<synchronous>, transform_indices = @transform_3, window_bounds = array<i64: 128, 128>}, {pipeline_mode = #tpu.pipeline_mode<synchronous>, transform_indices = @transform_4, window_bounds = array<i64: 1, 128>}, {pipeline_mode = #tpu.pipeline_mode<synchronous>, transform_indices = @transform_5, window_bounds = array<i64: 1, 128>}, {transform_indices = @transform_6, window_bounds = array<i64: 2, 128>}]} {
    %c0 = arith.constant 0 : index
    %c0_0 = arith.constant 0 : index
    %0 = vector.load %arg1[%c0, %c0_0] : memref<2x128xf32, #tpu.memory_space<vmem>>, vector<2x128xf32>
    %c0_1 = arith.constant 0 : index
    %c0_2 = arith.constant 0 : index
    %1 = vector.load %arg4[%c0_1, %c0_2] : memref<128x128xf32, #tpu.memory_space<vmem>>, vector<128x128xf32>
    %cst = arith.constant dense<0.000000e+00> : vector<2x128xf32>
    %2 = tpu.matmul %0, %1, %cst {dimension_numbers = #tpu.dot_dimension_numbers<[1], [0], [0], [1], [0, 0, 1, 1], [], []>} : vector<2x128xf32>, vector<128x128xf32>, vector<2x128xf32> -> vector<2x128xf32>
    %c0_3 = arith.constant 0 : index
    %c0_4 = arith.constant 0 : index
    %3 = vector.load %arg5[%c0_3, %c0_4] : memref<1x128xf32, #tpu.memory_space<vmem>>, vector<1x128xf32>
    %4 = vector.broadcast %3 : vector<1x128xf32> to vector<2x128xf32>
    %5 = arith.addf %2, %4 : vector<2x128xf32>
    %c0_5 = arith.constant 0 : index
    %c0_6 = arith.constant 0 : index
    %c0_7 = arith.constant 0 : index
    %6 = vector.load %arg3[%c0_5, %c0_6, %c0_7] : memref<2x16x128xbf16, #tpu.memory_space<vmem>>, vector<2x16x128xbf16>
    %7 = arith.extf %6 : vector<2x16x128xbf16> to vector<2x16x128xf32>
    %8 = vector.shape_cast %5 : vector<2x128xf32> to vector<2x1x128xf32>
    %9 = vector.broadcast %8 : vector<2x1x128xf32> to vector<2x16x128xf32>
    %10 = arith.addf %7, %9 : vector<2x16x128xf32>
    %11 = math.tanh %10 : vector<2x16x128xf32>
    %c0_8 = arith.constant 0 : index
    %c0_9 = arith.constant 0 : index
    %12 = vector.load %arg6[%c0_8, %c0_9] : memref<1x128xf32, #tpu.memory_space<vmem>>, vector<1x128xf32>
    %13 = vector.shape_cast %12 : vector<1x128xf32> to vector<1x1x128xf32>
    %14 = vector.broadcast %13 : vector<1x1x128xf32> to vector<2x16x128xf32>
    %15 = arith.mulf %11, %14 : vector<2x16x128xf32>
    %cst_10 = arith.constant dense<0.000000e+00> : vector<2x16xf32>
    %16 = vector.multi_reduction <add>, %15, %cst_10 [2] : vector<2x16x128xf32> to vector<2x16xf32>
    %cst_11 = arith.constant dense<0xFF800000> : vector<2xf32>
    %17 = vector.multi_reduction <maximumf>, %16, %cst_11 [1] : vector<2x16xf32> to vector<2xf32>
    %18 = vector.shape_cast %17 : vector<2xf32> to vector<2x1xf32>
    %19 = vector.broadcast %18 : vector<2x1xf32> to vector<2x16xf32>
    %20 = arith.subf %16, %19 : vector<2x16xf32>
    %21 = math.exp %20 : vector<2x16xf32>
    %cst_12 = arith.constant dense<0.000000e+00> : vector<2xf32>
    %22 = vector.multi_reduction <add>, %21, %cst_12 [1] : vector<2x16xf32> to vector<2xf32>
    %23 = vector.shape_cast %22 : vector<2xf32> to vector<2x1xf32>
    %24 = tpu.reciprocal %23 {approx = true} : vector<2x1xf32> -> vector<2x1xf32>
    %25 = vector.broadcast %24 : vector<2x1xf32> to vector<2x16xf32>
    %26 = arith.mulf %21, %25 : vector<2x16xf32>
    %cst_13 = arith.constant 0.000000e+00 : f32
    %27 = vector.broadcast %cst_13 : f32 to vector<2x128xf32>
    %c0_14 = arith.constant 0 : index
    %c0_15 = arith.constant 0 : index
    %c0_16 = arith.constant 0 : index
    %28 = vector.load %arg2[%c0_14, %c0_15, %c0_16] : memref<2x16x128xbf16, #tpu.memory_space<vmem>>, vector<2x16x128xbf16>
    %29 = arith.extf %28 : vector<2x16x128xbf16> to vector<2x16x128xf32>
    %30 = vector.shape_cast %26 : vector<2x16xf32> to vector<2x16x1xf32>
    %31 = vector.broadcast %30 : vector<2x16x1xf32> to vector<2x16x128xf32>
    %32 = arith.mulf %31, %29 : vector<2x16x128xf32>
    %cst_17 = arith.constant dense<0.000000e+00> : vector<2x128xf32>
    %33 = vector.multi_reduction <add>, %32, %cst_17 [1] : vector<2x16x128xf32> to vector<2x128xf32>
    %34 = arith.addf %27, %33 : vector<2x128xf32>
    %c0_18 = arith.constant 0 : index
    %c0_19 = arith.constant 0 : index
    %35 = vector.load %arg7[%c0_18, %c0_19] : memref<2x128xf32, #tpu.memory_space<vmem>>, vector<2x128xf32>
    tpu.vector_store %arg7[%c0_18, %c0_19], %34 {strides = array<i32>} : memref<2x128xf32, #tpu.memory_space<vmem>>, vector<2x128xf32>,
    return
  }
  func.func @transform_0(%arg0: i32) -> (i32, i32) {
    %c0_i32 = arith.constant 0 : i32
    %c0_i32_0 = arith.constant 0 : i32
    return %arg0, %c0_i32 : i32, i32
  }
  func.func @transform_1(%arg0: i32) -> (i32, i32, i32) {
    %c0_i32 = arith.constant 0 : i32
    %c0_i32_0 = arith.constant 0 : i32
    %c0_i32_1 = arith.constant 0 : i32
    return %arg0, %c0_i32, %c0_i32_0 : i32, i32, i32
  }
  func.func @transform_2(%arg0: i32) -> (i32, i32, i32) {
    %c0_i32 = arith.constant 0 : i32
    %c0_i32_0 = arith.constant 0 : i32
    %c0_i32_1 = arith.constant 0 : i32
    return %arg0, %c0_i32, %c0_i32_0 : i32, i32, i32
  }
  func.func @transform_3(%arg0: i32) -> (i32, i32) {
    %c0_i32 = arith.constant 0 : i32
    %c0_i32_0 = arith.constant 0 : i32
    %c0_i32_1 = arith.constant 0 : i32
    return %c0_i32, %c0_i32_0 : i32, i32
  }
  func.func @transform_4(%arg0: i32) -> (i32, i32) {
    %c0_i32 = arith.constant 0 : i32
    %c0_i32_0 = arith.constant 0 : i32
    %c0_i32_1 = arith.constant 0 : i32
    return %c0_i32, %c0_i32_0 : i32, i32
  }
  func.func @transform_5(%arg0: i32) -> (i32, i32) {
    %c0_i32 = arith.constant 0 : i32
    %c0_i32_0 = arith.constant 0 : i32
    %c0_i32_1 = arith.constant 0 : i32
    return %c0_i32, %c0_i32_0 : i32, i32
  }
  func.func @transform_6(%arg0: i32) -> (i32, i32) {
    %c0_i32 = arith.constant 0 : i32
    %c0_i32_0 = arith.constant 0 : i32
    return %arg0, %c0_i32 : i32, i32
  }
}

</mosaic_0001>

<bundles_post_ra>
// kernel: tpu_custom_call.1
= control target key start
LH: loop header
LB: loop body
LE: loop exit
PB: predicated region body
PF: predicated region fallthrough
CT: control target
= control target key end

     0   :  { %11 = vsyncpa [#allocation3], 0  ;;  %s811_s0 = inlined_call_operand.hbm [shape: f32[2,128], index: 0, kind: input, shape index: {}]   ;;  %s812_s1 = inlined_call_operand.hbm [shape: bf16[2,16,128], index: 1, kind: input, shape index: {}]   ;;  %s813_s2 = inlined_call_operand.hbm [shape: bf16[2,16,128], index: 2, kind: input, shape index: {}]   ;;  %s814_s3 = inlined_call_operand.hbm [shape: f32[128,128], index: 3, kind: input, shape index: {}]   ;;  %s815_s4 = inlined_call_operand.vmem [shape: f32[1,128], index: 4, kind: input, shape index: {}]   ;;  %s816_s5 = inlined_call_operand.vmem [shape: f32[1,128], index: 5, kind: input, shape index: {}]   ;;  %s817_s6 = inlined_call_operand.hbm [shape: f32[2,128], index: 6, kind: output, shape index: {}]  }
   0x1   :  { %12 = vsyncpa [#allocation6], 0 }
   0x2   :  { %13 = vsyncpa [#allocation9], 0 }
   0x3   :  { %14 = vsyncpa [#allocation4], 0  ;;  %s668_s21 = smov [#allocation5]   ;;  %s550_s25 = scalar_lea.hbm %s812_s1, 256 }
   0x4   :  { %s30_s22 = sshll.u32 %s668_s21, 4  ;;  %p551_p0 = scmp.ne.s32.totalorder %s812_s1, %s550_s25  ;;  %s31_s22 = int_to_ptr.vmem [resolvable:$true] %s30_s22 }
   0x5   :  { %p554_p1 = scmp.lt.u32.totalorder %s550_s25, %s812_s1 }
   0x7   :  { %p556_p2 = pnand %p554_p1, %p551_p0 }
   0x9   :  { %559 = shalt.err (!%p556_p2)
}
   0xa   :  { %s560_s30 = scalar_lea.vmem %s31_s22, 256  ;;  %p565_p4 = scmp.lt.s32.totalorder %s31_s22, %s31_s22 }
   0xb   :  { %p561_p3 = scmp.ne.s32.totalorder %s31_s22, %s560_s30  ;;  %p566_p5 = scmp.lt.s32.totalorder %s560_s30, %s560_s30 }
   0xd   :  { %p567_p6 = por %p566_p5, %p565_p4 }
   0xf   :  { %p568_p7 = pnand %p567_p6, %p561_p3 }
  0x11   :  { %571 = shalt.err (!%p568_p7)
}
  0x12   :  { %s669_s7 = smov 64   ;;  %s670_s8 = smov 4  }
  0x13   :  { %36 = dma.hbm_to_vmem [thread:$0]  %s812_s1, 256, %s31_s22, [#allocation6], %s669_s7, %s669_s7, %s670_s8  }
  0x14   :  { %s671_s11 = smov [#allocation2]   ;;  %s672_s13 = smov [#allocation7]  }
  0x15   :  { %s21_s12 = sshll.u32 %s671_s11, 4  ;;  %s42_s14 = sshll.u32 %s672_s13, 4  ;;  %s22_s12 = int_to_ptr.vmem [resolvable:$true] %s21_s12  ;;  %s43_s14 = int_to_ptr.vmem [resolvable:$true] %s42_s14 }
  0x16   :  { %s572_s17 = scalar_lea.hbm %s811_s0, 32 }
  0x17   :  { %p573_p8 = scmp.ne.s32.totalorder %s811_s0, %s572_s17  ;;  %p576_p9 = scmp.lt.u32.totalorder %s572_s17, %s811_s0 }
  0x19   :  { %p578_p10 = pnand %p576_p9, %p573_p8 }
  0x1b   :  { %581 = shalt.err (!%p578_p10)
}
  0x1c   :  { %s582_s1 = scalar_lea.vmem %s22_s12, 32  ;;  %p587_p12 = scmp.lt.s32.totalorder %s22_s12, %s22_s12 }
  0x1d   :  { %p583_p11 = scmp.ne.s32.totalorder %s22_s12, %s582_s1  ;;  %p588_p13 = scmp.lt.s32.totalorder %s582_s1, %s582_s1 }
  0x1f   :  { %p589_p0 = por %p588_p13, %p587_p12 }
  0x21   :  { %p590_p1 = pnand %p589_p0, %p583_p11 }
  0x23   :  { %593 = shalt.err (!%p590_p1)
}
  0x24   :  { %24 = dma.hbm_to_vmem [thread:$0]  %s811_s0, 32, %s22_s12, [#allocation3]  }
  0x25   :  { %s594_s26 = scalar_lea.hbm %s813_s2, 256 }
  0x26   :  { %p595_p2 = scmp.ne.s32.totalorder %s813_s2, %s594_s26  ;;  %p598_p3 = scmp.lt.u32.totalorder %s594_s26, %s813_s2 }
  0x28   :  { %p600_p4 = pnand %p598_p3, %p595_p2 }
  0x2a   :  { %603 = shalt.err (!%p600_p4)
}
  0x2b   :  { %s604_s9 = scalar_lea.vmem %s43_s14, 256  ;;  %p609_p6 = scmp.lt.s32.totalorder %s43_s14, %s43_s14 }
  0x2c   :  { %p605_p5 = scmp.ne.s32.totalorder %s43_s14, %s604_s9  ;;  %p610_p7 = scmp.lt.s32.totalorder %s604_s9, %s604_s9 }
  0x2e   :  { %p611_p8 = por %p610_p7, %p609_p6 }
  0x30   :  { %p612_p9 = pnand %p611_p8, %p605_p5 }
  0x32   :  { %615 = shalt.err (!%p612_p9)
}
  0x33   :  { %48 = dma.hbm_to_vmem [thread:$0]  %s813_s2, 256, %s43_s14, [#allocation6], %s669_s7, %s669_s7, %s670_s8  }
  0x34   :  { %s673_s11 = smov [#allocation8]   ;;  %s616_s16 = scalar_lea.hbm %s814_s3, 2048 }
  0x35   :  { %s54_s12 = sshll.u32 %s673_s11, 4  ;;  %p617_p10 = scmp.ne.s32.totalorder %s814_s3, %s616_s16  ;;  %s55_s12 = int_to_ptr.vmem [resolvable:$true] %s54_s12 }
  0x36   :  { %p620_p11 = scmp.lt.u32.totalorder %s616_s16, %s814_s3 }
  0x38   :  { %p622_p12 = pnand %p620_p11, %p617_p10 }
  0x3a   :  { %625 = shalt.err (!%p622_p12)
}
  0x3b   :  { %s626_s21 = scalar_lea.vmem %s55_s12, 2048  ;;  %p631_p0 = scmp.lt.s32.totalorder %s55_s12, %s55_s12 }
  0x3c   :  { %p627_p13 = scmp.ne.s32.totalorder %s55_s12, %s626_s21  ;;  %p632_p1 = scmp.lt.s32.totalorder %s626_s21, %s626_s21 }
  0x3e   :  { %p633_p2 = por %p632_p1, %p631_p0 }
  0x40   :  { %p634_p3 = pnand %p633_p2, %p627_p13 }
  0x42   :  { %637 = shalt.err (!%p634_p3)
}
  0x43   :  { %s674_s2 = smov 128   ;;  %s675_s7 = smov 8  }
  0x44   :  { %60 = dma.hbm_to_vmem [thread:$0]  %s814_s3, 2048, %s55_s12, [#allocation9], %s674_s2, %s674_s2, %s675_s7  }
  0x45   :  { %660 = dma.done.wait [#allocation3], 32  }
  0x46   :  { %661 = vsyncadd [#allocation3], 4294967264 }
  0x47   :  { %662 = dma.done.wait [#allocation6], 512  }
  0x48   :  { %663 = vsyncadd [#allocation6], 4294966784 }
  0x49   :  { %664 = dma.done.wait [#allocation9], 2048  }
  0x4a   :  { %665 = vsyncadd [#allocation9], 4294965248  ;;  %v676_v0 = vmov 0.0|0.0   ;;  %vm677_vm0 = vmmov 0   ;;  %v678_v1 = vmov 0.0   ;;  %v78_v2 = vld [vmem:[#allocation8] sm:$0xff]  ;;  %v183_v29 = vlaneseq }
  0x4b   :  { %492 = vmatprep.subr.bf16.mxu0 %v676_v0  ;;  %489 = vmatprep.mubr.msk.f32.mxu0 %vm677_vm0, %v678_v1  ;;  %v79_v3 = vld [vmem:[#allocation8 + $0x8] sm:$0xff]  ;;  %v80_v4 = vld [vmem:[#allocation8 + $0x10] sm:$0xff]  ;;  %v81_v6 = vld [vmem:[#allocation8 + $0x18] sm:$0xff]  ;;  %v679_v27 = vmov 1966171168   ;;  %vm254_vm1 = vcmask 130112  }
  0x4c   :  { %v493_v5 = vpack.c.bf16 %v79_v3, %v78_v2  ;;  %v496_v7 = vpack.c.bf16 %v81_v6, %v80_v4  ;;  %v82_v8 = vld [vmem:[#allocation8 + $0x20] sm:$0xff]  ;;  %v83_v9 = vld [vmem:[#allocation8 + $0x28] sm:$0xff]  ;;  %v84_v11 = vld [vmem:[#allocation8 + $0x30] sm:$0xff]  ;;  %v181_v28 = vunpack.c.l.s4 %v679_v27  ;;  %v771_v31 = vshrl.u32 %v183_v29, 7 }
  0x4d   :  { %v499_v10 = vpack.c.bf16 %v83_v9, %v82_v8  ;;  %v85_v12 = vld [vmem:[#allocation8 + $0x38] sm:$0xff]  ;;  %v86_v14 = vld [vmem:[#allocation8 + $0x40] sm:$0xff]  ;;  %v87_v15 = vld [vmem:[#allocation8 + $0x48] sm:$0xff]  ;;  %v244_v63 = vand.u32 127, %v183_v29  ;;  %vm265_vm2 = vcmask 1041409   ;;  %vm268_vm3 = vcmask 123904  }
  0x4e   :  { %494 = vmatpush3.bf16.msra.mxu0 %v493_v5  ;;  %v502_v13 = vpack.c.bf16 %v85_v12, %v84_v11  ;;  %v505_v16 = vpack.c.bf16 %v87_v15, %v86_v14  ;;  %v88_v17 = vld [vmem:[#allocation8 + $0x50] sm:$0xff]  ;;  %v89_v18 = vld [vmem:[#allocation8 + $0x58] sm:$0xff]  ;;  %v90_v20 = vld [vmem:[#allocation8 + $0x60] sm:$0xff]  ;;  %v182_v30 = vunpack.c.0.s8 %v181_v28  ;;  %v778_v39 = vsub.s32 0, %v771_v31 }
  0x4f   :  { %495 = vmatprep.subr.bf16.mxu0 %v676_v0  ;;  %v508_v19 = vpack.c.bf16 %v89_v18, %v88_v17  ;;  %v91_v21 = vld [vmem:[#allocation8 + $0x68] sm:$0xff]  ;;  %v92_v23 = vld [vmem:[#allocation8 + $0x70] sm:$0xff]  ;;  %v93_v24 = vld [vmem:[#allocation8 + $0x78] sm:$0xff]  ;;  %v247_v4 = vsub.s32 %v244_v63, %v771_v31  ;;  %v680_v15 = vmov 0  }
  0x50   :  { %v511_v22 = vpack.c.bf16 %v91_v21, %v90_v20  ;;  %v514_v25 = vpack.c.bf16 %v93_v24, %v92_v23  ;;  %v77_v26 = vld [vmem:[#allocation2] sm:$0x3]  ;;  %v185_v33 = vsub.s32 %v182_v30, %v771_v31  ;;  %v423_v37 = vld [vmem:[#allocation7] sm:$0xff]   ;;  %531 = vset.pattern.permute.xlu0 %v680_v15  ;;  %530 = vset.pattern.permute.xlu1 %v680_v15 }
  0x51   :  { %v420_v32 = vld [vmem:[%s815_s4] ss:$0 sm:$0xff]  ;;  %v424_v41 = vunpack.c.l.bf16 %v423_v37  ;;  %v425_v42 = vunpack.c.h.bf16 %v423_v37 }
  0x52   :  { %497 = vmatpush3.bf16.msra.mxu0 %v496_v7  ;;  %v438_v40 = vld [vmem:[#allocation7 + $0x8] sm:$0xff]  }
  0x53   :  { %498 = vmatprep.subr.bf16.mxu0 %v676_v0  ;;  %v428_v45 = vunpack.c.l.bf16 %v438_v40  ;;  %v429_v48 = vunpack.c.h.bf16 %v438_v40  ;;  %v421_v54 = vld [vmem:[%s816_s5] ss:$0 sm:$0xff]  ;;  %s681_s5 = smov [#allocation10]  }
  0x54   :  { %s409_s23 = sshll.u32 %s681_s5, 4  ;;  %s410_s23 = int_to_ptr.vmem [resolvable:$true] %s409_s23 }
  0x55   :  { %s638_s24 = scalar_lea.vmem %s410_s23, 32  ;;  %p643_p5 = scmp.lt.s32.totalorder %s410_s23, %s410_s23 }
  0x56   :  { %500 = vmatpush3.bf16.msra.mxu0 %v499_v10  ;;  %p639_p4 = scmp.ne.s32.totalorder %s410_s23, %s638_s24  ;;  %p644_p6 = scmp.lt.s32.totalorder %s638_s24, %s638_s24 }
  0x57   :  { %501 = vmatprep.subr.bf16.mxu0 %v676_v0 }
  0x58   :  { %p645_p7 = por %p644_p6, %p643_p5 }
  0x5a   :  { %503 = vmatpush3.bf16.msra.mxu0 %v502_v13  ;;  %p646_p8 = pnand %p645_p7, %p639_p4 }
  0x5b   :  { %504 = vmatprep.subr.bf16.mxu0 %v676_v0 }
  0x5e   :  { %506 = vmatpush3.bf16.msra.mxu0 %v505_v16  ;;  %v279_v16 = vsub.s32 1, %v771_v31 }
  0x5f   :  { %507 = vmatprep.subr.bf16.mxu0 %v676_v0 }
  0x62   :  { %509 = vmatpush3.bf16.msra.mxu0 %v508_v19 }
  0x63   :  { %510 = vmatprep.subr.bf16.mxu0 %v676_v0 }
  0x66   :  { %512 = vmatpush3.bf16.msra.mxu0 %v511_v22 }
  0x67   :  { %513 = vmatprep.subr.bf16.mxu0 %v676_v0  ;;  %v249_v0 = vadd.s32 4294967288, %v244_v63 }
  0x69   :  { %v252_v2 = vsub.s32 %v249_v0, %v771_v31 }
  0x6a   :  { %515 = vmatpush3.bf16.msra.mxu0 %v514_v25 }
  0x6d   :  { %490 = vmatmul.mubr.f32.vlgmr.msra.gmra.mrb[0].mxu0 %v77_v26 }
 0x140   :  { %v167_v34 = vpop.f32.mrb[0].mxu0 }
 0x141   :  { %v168_v35 = vadd.f32 %v420_v32, %v167_v34  ;;  %v491_v36 = vpop.f32.mrb[1].mxu0 }
 0x143   :  { %v186_v38 = vrot.slane %v168_v35, %v185_v33 }
 0x145   :  { %v187_v43 = vcombine.high %v186_v38, %v186_v38  ;;  %v194_v44 = vrot.slane %v186_v38, %v185_v33 }
 0x147   :  { %v201_v46 = vrot.slane %v187_v43, %v185_v33  ;;  %v205_v47 = vrot.slane %v194_v44, %v778_v39 }
 0x149   :  { %v209_v49 = vrot.slane %v201_v46, %v778_v39  ;;  %v212_v50 = vadd.f32 %v424_v41, %v205_v47  ;;  %v213_v51 = vadd.f32 %v425_v42, %v205_v47 }
 0x14b   :  { %v214_v52 = vadd.f32 %v428_v45, %v209_v49  ;;  %532 = vtanh.f32 %v212_v50  ;;  %v215_v53 = vadd.f32 %v429_v48, %v209_v49 }
 0x14c   :  { %534 = vtanh.f32 %v213_v51 }
 0x14d   :  { %536 = vtanh.f32 %v214_v52 }
 0x14e   :  { %538 = vtanh.f32 %v215_v53  ;;  %v431_v53 = vld [vmem:[#allocation5] sm:$0xff]  }
 0x155   :  { %v533_v55 = vpop.eup %532 }
 0x156   :  { %v227_v56 = vmul.f32 %v533_v55, %v421_v54  ;;  %v535_v57 = vpop.eup %534  ;;  %v432_v55 = vunpack.c.l.bf16 %v431_v53 }
 0x157   :  { %v537_v58 = vpop.eup %536  ;;  %v228_v61 = vmul.f32 %v535_v57, %v421_v54 }
 0x158   :  { %231 = vadd.xlane.f32.xlu0 %v227_v56  ;;  %v229_v59 = vmul.f32 %v537_v58, %v421_v54  ;;  %v539_v60 = vpop.eup %538  ;;  %v433_v56 = vunpack.c.h.bf16 %v431_v53 }
 0x159   :  { %v230_v62 = vmul.f32 %v539_v60, %v421_v54  ;;  %v439_v60 = vld [vmem:[#allocation5 + $0x8] sm:$0xff]  }
 0x15a   :  { %235 = vadd.xlane.f32.xlu1 %v229_v59  ;;  %v436_v63 = vunpack.c.l.bf16 %v439_v60  ;;  %v437_v0 = vunpack.c.h.bf16 %v439_v60 }
 0x15c   :  { %233 = vadd.xlane.f32.xlu0 %v228_v61 }
 0x15e   :  { %237 = vadd.xlane.f32.xlu1 %v230_v62 }
 0x1e5   :  { %v232_v1 = vpop.xlane.xlu0 %231 }
 0x1e6   :  { %v248_v8 = vrot.slane %v232_v1, %v247_v4 }
 0x1e7   :  { %v236_v3 = vpop.xlane.xlu1 %235 }
 0x1e8   :  { %v259_v9 = vrot.slane %v236_v3, %v247_v4 }
 0x1e9   :  { %v234_v5 = vpop.xlane.xlu0 %233 }
 0x1ea   :  { %v253_v6 = vrot.slane %v234_v5, %v252_v2 }
 0x1eb   :  { %v238_v7 = vpop.xlane.xlu1 %237 }
 0x1ec   :  { %v263_v10 = vrot.slane %v238_v7, %v252_v2  ;;  %v255_v11 = vsel %vm254_vm1, %v253_v6, %v248_v8 }
 0x1ee   :  { %v264_v12 = vsel %vm254_vm1, %v263_v10, %v259_v9 }
 0x1ef   :  { %v266_v13 = vsel %vm265_vm2, %v264_v12, %v255_v11 }
 0x1f0   :  { %v269_v14 = vsel %vm268_vm3, %v266_v13, -inf }
 0x1f1   :  { %270 = vmax.xlane.f32.xlu0 %v269_v14 }
 0x27e   :  { %v271_v17 = vpop.xlane.xlu0 %270 }
 0x27f   :  { %v276_v18 = vrot.slane %v271_v17, %v778_v39  ;;  %v280_v19 = vrot.slane %v271_v17, %v279_v16 }
 0x281   :  { %v283_v20 = vsub.f32 %v232_v1, %v276_v18  ;;  %v284_v21 = vsub.f32 %v234_v5, %v276_v18  ;;  %v285_v22 = vsub.f32 %v236_v3, %v280_v19  ;;  %v286_v25 = vsub.f32 %v238_v7, %v280_v19 }
 0x283   :  { %v287_v23 = vmul.f32 1.442695, %v283_v20  ;;  %v289_v24 = vmul.f32 1.442695, %v284_v21  ;;  %v291_v26 = vmul.f32 1.442695, %v285_v22 }
 0x284   :  { %v293_v27 = vmul.f32 1.442695, %v286_v25 }
 0x285   :  { %540 = vpow2.f32 %v287_v23 }
 0x286   :  { %542 = vpow2.f32 %v289_v24 }
 0x287   :  { %544 = vpow2.f32 %v291_v26 }
 0x288   :  { %546 = vpow2.f32 %v293_v27 }
 0x28f   :  { %v541_v28 = vpop.eup %540 }
 0x290   :  { %v543_v29 = vpop.eup %542  ;;  %300 = vperm.xlu1 %530, %v541_v28  }
 0x291   :  { %303 = vperm.xlu0 %531, %v543_v29   ;;  %v545_v30 = vpop.eup %544 }
 0x292   :  { %v547_v31 = vpop.eup %546 }
 0x294   :  { %306 = vperm.xlu1 %530, %v545_v30  }
 0x298   :  { %309 = vperm.xlu1 %530, %v547_v31  }
 0x30f   :  { %v301_v32 = vpop.permute.xlu1 %300 }
 0x310   :  { %v304_v33 = vpop.permute.xlu0 %303  ;;  %v314_v36 = vrot.slane %v301_v32, %v247_v4 }
 0x311   :  { %v318_v35 = vrot.slane %v304_v33, %v252_v2 }
 0x313   :  { %v307_v34 = vpop.permute.xlu1 %306  ;;  %v319_v41 = vsel %vm254_vm1, %v318_v35, %v314_v36 }
 0x314   :  { %v323_v38 = vrot.slane %v307_v34, %v247_v4 }
 0x317   :  { %v310_v37 = vpop.permute.xlu1 %309 }
 0x318   :  { %v327_v40 = vrot.slane %v310_v37, %v252_v2 }
 0x31a   :  { %v328_v42 = vsel %vm254_vm1, %v327_v40, %v323_v38 }
 0x31b   :  { %v329_v43 = vsel %vm265_vm2, %v328_v42, %v319_v41 }
 0x31c   :  { %v331_v44 = vsel %vm268_vm3, %v329_v43, 0.0 }
 0x31d   :  { %332 = vadd.xlane.f32.xlu1 %v331_v44 }
 0x3aa   :  { %v333_v45 = vpop.xlane.xlu1 %332 }
 0x3ab   :  { %548 = vrcp.f32 %v333_v45 }
 0x3b5   :  { %v549_v46 = vpop.eup %548 }
 0x3b6   :  { %v339_v47 = vrot.slane %v549_v46, %v778_v39  ;;  %v343_v50 = vrot.slane %v549_v46, %v279_v16 }
 0x3b8   :  { %v346_v48 = vmul.f32 %v541_v28, %v339_v47  ;;  %v347_v49 = vmul.f32 %v543_v29, %v339_v47  ;;  %v348_v51 = vmul.f32 %v545_v30, %v343_v50  ;;  %v349_v52 = vmul.f32 %v547_v31, %v343_v50 }
 0x3ba   :  { %360 = vperm.xlu0 %531, %v346_v48  }
 0x3be   :  { %365 = vperm.xlu0 %531, %v347_v49  }
 0x3c2   :  { %370 = vperm.xlu0 %531, %v348_v51  }
 0x3c6   :  { %375 = vperm.xlu0 %531, %v349_v52  }
 0x439   :  { %v361_v54 = vpop.permute.xlu0 %360 }
 0x43a   :  { %v378_v58 = vmul.f32 %v432_v55, %v361_v54 }
 0x43d   :  { %v366_v57 = vpop.permute.xlu0 %365 }
 0x43e   :  { %v379_v59 = vmul.f32 %v433_v56, %v366_v57 }
 0x440   :  { %v382_v61 = vadd.f32 %v379_v59, %v378_v58 }
 0x441   :  { %v371_v62 = vpop.permute.xlu0 %370 }
 0x442   :  { %v383_v39 = vrot.slane %v382_v61, 4  ;;  %v380_v3 = vmul.f32 %v436_v63, %v371_v62 }
 0x444   :  { %v384_v1 = vadd.f32 %v383_v39, %v382_v61 }
 0x445   :  { %v376_v2 = vpop.permute.xlu0 %375 }
 0x446   :  { %v381_v4 = vmul.f32 %v437_v0, %v376_v2  ;;  %v385_v5 = vrot.slane %v384_v1, 2 }
 0x448   :  { %v389_v6 = vadd.f32 %v381_v4, %v380_v3  ;;  %v386_v8 = vadd.f32 %v385_v5, %v384_v1 }
 0x44a   :  { %v390_v7 = vrot.slane %v389_v6, 4  ;;  %v387_v11 = vrot.slane %v386_v8, 1 }
 0x44c   :  { %v391_v9 = vadd.f32 %v390_v7, %v389_v6  ;;  %v388_v14 = vadd.f32 %v387_v11, %v386_v8 }
 0x44e   :  { %v392_v10 = vrot.slane %v391_v9, 2 }
 0x450   :  { %v393_v12 = vadd.f32 %v392_v10, %v391_v9 }
 0x452   :  { %v394_v13 = vrot.slane %v393_v12, 1 }
 0x454   :  { %v395_v15 = vadd.f32 %v394_v13, %v393_v12 }
 0x456   :  { %v400_v16 = vsel %vm265_vm2, %v395_v15, %v388_v14 }
 0x457   :  { %402 = vst [vmem:[#allocation10] sm:$0x3] %v400_v16 }
 0x458   :  { %649 = shalt.err (!%p646_p8)
}
 0x459   :  { %s650_s27 = scalar_lea.hbm %s817_s6, 32 }
 0x45a   :  { %p651_p9 = scmp.ne.s32.totalorder %s817_s6, %s650_s27  ;;  %p654_p10 = scmp.lt.u32.totalorder %s650_s27, %s817_s6 }
 0x45c   :  { %p656_p11 = pnand %p654_p10, %p651_p9 }
 0x45e   :  { %659 = shalt.err (!%p656_p11)
}
 0x45f   :  { %412 = dma.vmem_to_hbm [thread:$0]  %s410_s23, 32, %s817_s6, [#allocation4]  }
 0x460   :  { %666 = dma.done.wait [#allocation4], 32  }
 0x461   :  { %667 = vsyncadd [#allocation4], 4294967264 }
 0x462   :  { %416 = vsyncpa [#allocation3], 1 }
 0x463   :  { %417 = vsyncpa [#allocation6], 1 }
 0x464   :  { %418 = vsyncpa [#allocation9], 1 }
 0x465   :  { %419 = vsyncpa [#allocation4], 1 }

</bundles_post_ra>
